<compile_context>
chip_gen: v7x
topology: tpu7x:2x2x1
jax: 0.10.0
libtpu: 0.0.40
codegen_flags: <defaults>
</compile_context>

<pallas_src>
import functools

import jax
import jax.numpy as jnp
from jax.experimental import pallas as pl
from jax.experimental.pallas import tpu as pltpu

IN_FEATURES = 2
OUT_FEATURES = 2
HIDDEN = 100          # logical hidden width of the MLP
HIDDEN_PAD = 128      # lane-padded hidden width (full vreg lanes / MXU width)


def _round_up(x, m):
    return (x + m - 1) // m * m


def _detect_tpu_generation():
    try:
        kind = jax.devices()[0].device_kind.lower()
    except Exception:  # pragma: no cover - backend init failure
        return 0
    for gen in (7, 6, 5, 4, 3, 2):
        if f"v{gen}" in kind:
            return gen
    return 0


_TPU_GEN = _detect_tpu_generation()
# v6e / v7x: 256-wide MXU -> pack two batch chunks block-diagonally per grid
# step and run elementwise math in bf16 (they have bf16 VALUs).
# v5e and older: 128-wide MXU -> single chunk, f32 elementwise.
_N_CHUNKS = 2 if _TPU_GEN >= 6 else 1
_ELTWISE_BF16 = _TPU_GEN >= 6


def mlp_kernel(x_ref, w1_ref, b1_ref, w2_ref, b2_ref, w3_ref, b3_ref, o_ref,
               *, nb, n_chunks, eltwise_bf16):
    """One batch tile (n_chunks * nb columns) of the fused MLP on x^T."""
    # Loop-invariant loads hoisted out of the (statically unrolled) chunk loop.
    w1c0 = w1_ref[:, 0:1]                      # (128, 1) f32
    w1c1 = w1_ref[:, 1:2]                      # (128, 1) f32
    b1 = b1_ref[...]                           # (128, 1) f32

    h1_chunks = []
    for c in range(n_chunks):
        xc = x_ref[:, c * nb:(c + 1) * nb]     # (2, nb) f32
        # fc1: K=2 contraction -> two VPU broadcast FMAs (skip the MXU).
        h1 = w1c0 * xc[0:1, :] + w1c1 * xc[1:2, :] + b1      # (128, nb) f32
        if eltwise_bf16:
            h1 = h1.astype(jnp.bfloat16)       # cast first: ReLU commutes
        h1 = jnp.maximum(h1, 0.0)
        if not eltwise_bf16:
            h1 = h1.astype(jnp.bfloat16)
        h1_chunks.append(h1)
    # Stack chunks on sublanes so one MXU pass against the block-diagonal W2
    # serves all chunks (fills the 256-wide MXU on v6e/v7x).
    h1s = h1_chunks[0] if n_chunks == 1 else jnp.concatenate(h1_chunks, axis=0)

    # fc2: bf16 operands, f32 accumulate.
    h2 = jnp.dot(w2_ref[...], h1s, preferred_element_type=jnp.float32)
    h2 = h2 + b2_ref[...]                      # (128*n_chunks, nb) f32
    if eltwise_bf16:
        h2 = h2.astype(jnp.bfloat16)
    h2 = jnp.maximum(h2, 0.0)
    if not eltwise_bf16:
        h2 = h2.astype(jnp.bfloat16)

    # fc3 + tanh (block-diagonal W3 -> rows 2c:2c+2 belong to chunk c).
    h3 = jnp.dot(w3_ref[...], h2, preferred_element_type=jnp.float32)
    y = jnp.tanh(h3 + b3_ref[...])             # (2*n_chunks, nb) f32

    for c in range(n_chunks):
        o_ref[:, c * nb:(c + 1) * nb] = y[2 * c:2 * c + 2, :]


def _fused_mlp_t(xt, w1p, b1p, w2p, b2p, w3p, b3p, rows_blk):
    """Core fused MLP on transposed input: xt (2, N) f32 -> (2, N) f32."""
    assert rows_blk > 0 and rows_blk % 128 == 0, "rows_blk must be a positive multiple of 128"
    n_chunks = w2p.shape[0] // HIDDEN_PAD      # derived from packed weights
    eltwise_bf16 = _ELTWISE_BF16 and n_chunks >= 2

    n = xt.shape[1]
    min_step = 128 * n_chunks                  # smallest legal grid step (cols)
    max_step = n_chunks * rows_blk
    n_min = _round_up(n, min_step)

    if n_min > max_step:
        nb = rows_blk                          # already >= 2 grid steps
    elif n_min >= 2 * min_step:
        # Split into (at least) 2 grid steps so the "parallel" batch axis can
        # shard across both TensorCores on v7x; harmless elsewhere.
        half = _round_up((n_min + 1) // 2, min_step)
        nb = half // n_chunks
    else:
        nb = n_min // n_chunks
    step = n_chunks * nb
    n_pad = _round_up(n, step)
    grid = (n_pad // step,)

    if n_pad != n:
        xt = jnp.zeros((IN_FEATURES, n_pad), jnp.float32).at[:, :n].set(xt)

    hp = HIDDEN_PAD * n_chunks
    op = OUT_FEATURES * n_chunks
    resident = lambda i: (0, 0)                # weights/biases stay VMEM-resident
    kernel = functools.partial(mlp_kernel, nb=nb, n_chunks=n_chunks,
                               eltwise_bf16=eltwise_bf16)

    out_t = pl.pallas_call(
        kernel,
        out_shape=jax.ShapeDtypeStruct((OUT_FEATURES, n_pad), jnp.float32),
        grid=grid,
        in_specs=[
            pl.BlockSpec((IN_FEATURES, step), lambda i: (0, i)),   # x^T tile
            pl.BlockSpec((HIDDEN_PAD, IN_FEATURES), resident),     # W1 (f32)
            pl.BlockSpec((HIDDEN_PAD, 1), resident),               # b1 (f32)
            pl.BlockSpec((hp, hp), resident),                      # W2 (bf16, block-diag)
            pl.BlockSpec((hp, 1), resident),                       # b2 (f32, stacked)
            pl.BlockSpec((op, hp), resident),                      # W3 (bf16, block-diag)
            pl.BlockSpec((op, 1), resident),                       # b3 (f32, stacked)
        ],
        out_specs=pl.BlockSpec((OUT_FEATURES, step), lambda i: (0, i)),
        compiler_params=pltpu.CompilerParams(
            dimension_semantics=("parallel",),   # batch tiles shard across TCs
            vmem_limit_bytes=48 * 1024 * 1024),  # room for the big batch tile
    )(xt, w1p, b1p, w2p, b2p, w3p, b3p)

    return out_t[:, :n] if n_pad != n else out_t


@functools.partial(jax.jit, static_argnames=("rows_blk",))
def rep1_forward_t(xt, w1p, b1p, w2p, b2p, w3p, b3p, *, rows_blk=4096):
    """Transposed API: xt (2, N) f32 -> (2, N) f32 (no layout plumbing)."""
    return _fused_mlp_t(xt, w1p, b1p, w2p, b2p, w3p, b3p, rows_blk)


@functools.partial(jax.jit, static_argnames=("rows_blk",))
def rep1_forward(x, w1p, b1p, w2p, b2p, w3p, b3p, *, rows_blk=4096):
    """PyTorch-compatible API: x (N, 2) f32 -> (N, 2) f32."""
    out_t = _fused_mlp_t(x.T, w1p, b1p, w2p, b2p, w3p, b3p, rows_blk)
    return out_t.T


def init_params(key):
    """nn.Linear-style init: U(+/- 1/sqrt(fan_in)); W stored (out, in)."""
    def linear(k, fan_in, fan_out):
        k_w, k_b = jax.random.split(k)
        bound = 1.0 / jnp.sqrt(jnp.float32(fan_in))
        w = jax.random.uniform(k_w, (fan_out, fan_in), jnp.float32, -bound, bound)
        b = jax.random.uniform(k_b, (fan_out,), jnp.float32, -bound, bound)
        return w, b

    k1, k2, k3 = jax.random.split(key, 3)
    w1, b1 = linear(k1, IN_FEATURES, HIDDEN)
    w2, b2 = linear(k2, HIDDEN, HIDDEN)
    w3, b3 = linear(k3, HIDDEN, OUT_FEATURES)
    return w1, b1, w2, b2, w3, b3


def prepare_params(w1, b1, w2, b2, w3, b3, n_chunks=None):
    """Zero-pad hidden 100->128, bf16-cast MXU weights, and (on v6e/v7x) pack
    W2/W3 as n_chunks-way block-diagonals so one MXU pass serves n_chunks
    batch chunks.  All padding is numerically exact: padded rows of W1/b1
    yield ReLU(0)=0 activations feeding zero-padded W2/W3 columns, and the
    off-diagonal blocks are exact zeros.
    """
    if n_chunks is None:
        n_chunks = _N_CHUNKS

    w1p = jnp.zeros((HIDDEN_PAD, IN_FEATURES), jnp.float32).at[:HIDDEN, :].set(w1)
    b1p = jnp.zeros((HIDDEN_PAD, 1), jnp.float32).at[:HIDDEN, 0].set(b1)

    w2_pad = jnp.zeros((HIDDEN_PAD, HIDDEN_PAD), jnp.float32).at[:HIDDEN, :HIDDEN].set(w2)
    w3_pad = jnp.zeros((OUT_FEATURES, HIDDEN_PAD), jnp.float32).at[:, :HIDDEN].set(w3)
    b2_pad = jnp.zeros((HIDDEN_PAD, 1), jnp.float32).at[:HIDDEN, 0].set(b2)
    b3_pad = b3.reshape(OUT_FEATURES, 1).astype(jnp.float32)

    hp = HIDDEN_PAD * n_chunks
    op = OUT_FEATURES * n_chunks
    w2p = jnp.zeros((hp, hp), jnp.float32)
    w3p = jnp.zeros((op, hp), jnp.float32)
    for c in range(n_chunks):
        w2p = w2p.at[c * HIDDEN_PAD:(c + 1) * HIDDEN_PAD,
                     c * HIDDEN_PAD:(c + 1) * HIDDEN_PAD].set(w2_pad)
        w3p = w3p.at[c * OUT_FEATURES:(c + 1) * OUT_FEATURES,
                     c * HIDDEN_PAD:(c + 1) * HIDDEN_PAD].set(w3_pad)
    w2p = w2p.astype(jnp.bfloat16)
    w3p = w3p.astype(jnp.bfloat16)
    b2p = jnp.tile(b2_pad, (n_chunks, 1))
    b3p = jnp.tile(b3_pad, (n_chunks, 1))
    return w1p, b1p, w2p, b2p, w3p, b3p


def reference_forward_f32(x, w1, b1, w2, b2, w3, b3):
    h = jnp.maximum(x @ w1.T + b1, 0.0)
    h = jnp.maximum(h @ w2.T + b2, 0.0)
    return jnp.tanh(h @ w3.T + b3)


def reference_forward_bf16(x, w1, b1, w2, b2, w3, b3):
    """Same math as the kernel: bf16 MXU operands, f32 accumulate/elementwise."""
    h = jnp.maximum(x @ w1.T + b1, 0.0)
    h = jnp.maximum(
        jnp.dot(h.astype(jnp.bfloat16), w2.T.astype(jnp.bfloat16),
                preferred_element_type=jnp.float32) + b2, 0.0)
    return jnp.tanh(
        jnp.dot(h.astype(jnp.bfloat16), w3.T.astype(jnp.bfloat16),
                preferred_element_type=jnp.float32) + b3)


if __name__ == "__main__":
    key = jax.random.PRNGKey(0)
    k_params, k_x1, k_x2, k_x3 = jax.random.split(key, 4)
    raw = init_params(k_params)
    params = prepare_params(*raw)

    # Small batch of 2-feature points (matches nn.Linear(2, 100) input).
    x = jax.random.normal(k_x1, (64, IN_FEATURES), dtype=jnp.float32)
    out = jax.block_until_ready(rep1_forward(x, *params))
    ref_bf16 = reference_forward_bf16(x, *raw)
    ref_f32 = reference_forward_f32(x, *raw)
    assert out.shape == (64, OUT_FEATURES)
    assert jnp.allclose(out, ref_bf16, atol=5e-3, rtol=5e-3), \
        float(jnp.max(jnp.abs(out - ref_bf16)))
    assert jnp.allclose(out, ref_f32, atol=5e-2, rtol=5e-2), \
        float(jnp.max(jnp.abs(out - ref_f32)))

    # Multi-step grid + ragged batch with the smallest legal tile.
    x2 = jax.random.normal(k_x2, (300, IN_FEATURES), dtype=jnp.float32)
    out2 = jax.block_until_ready(rep1_forward(x2, *params, rows_blk=128))
    ref2 = reference_forward_bf16(x2, *raw)
    assert out2.shape == (300, OUT_FEATURES)
    assert jnp.allclose(out2, ref2, atol=5e-3, rtol=5e-3), \
        float(jnp.max(jnp.abs(out2 - ref2)))

    # Default tile, batch large enough to exercise the >=2-step split (both
    # TensorCores on v7x) plus the transposed, plumbing-free entry point.
    x3 = jax.random.normal(k_x3, (1000, IN_FEATURES), dtype=jnp.float32)
    out3_t = jax.block_until_ready(rep1_forward_t(x3.T, *params))
    ref3 = reference_forward_bf16(x3, *raw)
    assert out3_t.shape == (OUT_FEATURES, 1000)
    assert jnp.allclose(out3_t.T, ref3, atol=5e-3, rtol=5e-3), \
        float(jnp.max(jnp.abs(out3_t.T - ref3)))

    print("KERNEL_OK")
</pallas_src>

<mosaic_0001>
module attributes {stable_mosaic.version = 11 : i64} {
  func.func @mlp_kernel(%arg0: i32, %arg1: memref<2x128xf32, #tpu.memory_space<vmem>>, %arg2: memref<128x2xf32, #tpu.memory_space<vmem>>, %arg3: memref<128x1xf32, #tpu.memory_space<vmem>>, %arg4: memref<128x128xbf16, #tpu.memory_space<vmem>>, %arg5: memref<128x1xf32, #tpu.memory_space<vmem>>, %arg6: memref<2x128xbf16, #tpu.memory_space<vmem>>, %arg7: memref<2x1xf32, #tpu.memory_space<vmem>>, %arg8: memref<2x128xf32, #tpu.memory_space<vmem>>) attributes {dimension_semantics = [#tpu.dimension_semantics<parallel>], iteration_bounds = array<i64: 1>, scalar_prefetch = 0 : i64, scratch_operands = 0 : i64, tpu.core_type = #tpu.core_type<tc>, window_params = [{transform_indices = @transform_0, window_bounds = array<i64: 2, 128>}, {pipeline_mode = #tpu.pipeline_mode<synchronous>, transform_indices = @transform_1, window_bounds = array<i64: 128, 2>}, {pipeline_mode = #tpu.pipeline_mode<synchronous>, transform_indices = @transform_2, window_bounds = array<i64: 128, 1>}, {pipeline_mode = #tpu.pipeline_mode<synchronous>, transform_indices = @transform_3, window_bounds = array<i64: 128, 128>}, {pipeline_mode = #tpu.pipeline_mode<synchronous>, transform_indices = @transform_4, window_bounds = array<i64: 128, 1>}, {pipeline_mode = #tpu.pipeline_mode<synchronous>, transform_indices = @transform_5, window_bounds = array<i64: 2, 128>}, {pipeline_mode = #tpu.pipeline_mode<synchronous>, transform_indices = @transform_6, window_bounds = array<i64: 2, 1>}, {transform_indices = @transform_7, window_bounds = array<i64: 2, 128>}]} {
    %c0 = arith.constant 0 : index
    %c0_0 = arith.constant 0 : index
    %0 = vector.load %arg2[%c0, %c0_0] : memref<128x2xf32, #tpu.memory_space<vmem>>, vector<128x1xf32>
    %c0_1 = arith.constant 0 : index
    %c1 = arith.constant 1 : index
    %1 = vector.load %arg2[%c0_1, %c1] : memref<128x2xf32, #tpu.memory_space<vmem>>, vector<128x1xf32>
    %c0_2 = arith.constant 0 : index
    %c0_3 = arith.constant 0 : index
    %2 = vector.load %arg3[%c0_2, %c0_3] : memref<128x1xf32, #tpu.memory_space<vmem>>, vector<128x1xf32>
    %c0_4 = arith.constant 0 : index
    %c0_5 = arith.constant 0 : index
    %3 = vector.load %arg1[%c0_4, %c0_5] : memref<2x128xf32, #tpu.memory_space<vmem>>, vector<2x128xf32>
    %4 = vector.extract_strided_slice %3 {offsets = [0, 0], sizes = [1, 128], strides = [1, 1]} : vector<2x128xf32> to vector<1x128xf32>
    %5 = vector.broadcast %0 : vector<128x1xf32> to vector<128x128xf32>
    %6 = vector.broadcast %4 : vector<1x128xf32> to vector<128x128xf32>
    %7 = arith.mulf %5, %6 : vector<128x128xf32>
    %8 = vector.extract_strided_slice %3 {offsets = [1, 0], sizes = [1, 128], strides = [1, 1]} : vector<2x128xf32> to vector<1x128xf32>
    %9 = vector.broadcast %1 : vector<128x1xf32> to vector<128x128xf32>
    %10 = vector.broadcast %8 : vector<1x128xf32> to vector<128x128xf32>
    %11 = arith.mulf %9, %10 : vector<128x128xf32>
    %12 = arith.addf %7, %11 : vector<128x128xf32>
    %13 = vector.broadcast %2 : vector<128x1xf32> to vector<128x128xf32>
    %14 = arith.addf %12, %13 : vector<128x128xf32>
    %cst = arith.constant 0.000000e+00 : f32
    %15 = vector.broadcast %cst : f32 to vector<128x128xf32>
    %16 = arith.maximumf %14, %15 : vector<128x128xf32>
    %17 = arith.truncf %16 : vector<128x128xf32> to vector<128x128xbf16>
    %c0_6 = arith.constant 0 : index
    %c0_7 = arith.constant 0 : index
    %18 = vector.load %arg4[%c0_6, %c0_7] : memref<128x128xbf16, #tpu.memory_space<vmem>>, vector<128x128xbf16>
    %cst_8 = arith.constant dense<0.000000e+00> : vector<128x128xf32>
    %19 = tpu.matmul %18, %17, %cst_8 {dimension_numbers = #tpu.dot_dimension_numbers<[1], [0], [0], [1], [0, 0, 1, 1], [], []>} : vector<128x128xbf16>, vector<128x128xbf16>, vector<128x128xf32> -> vector<128x128xf32>
    %c0_9 = arith.constant 0 : index
    %c0_10 = arith.constant 0 : index
    %20 = vector.load %arg5[%c0_9, %c0_10] : memref<128x1xf32, #tpu.memory_space<vmem>>, vector<128x1xf32>
    %21 = vector.broadcast %20 : vector<128x1xf32> to vector<128x128xf32>
    %22 = arith.addf %19, %21 : vector<128x128xf32>
    %cst_11 = arith.constant 0.000000e+00 : f32
    %23 = vector.broadcast %cst_11 : f32 to vector<128x128xf32>
    %24 = arith.maximumf %22, %23 : vector<128x128xf32>
    %25 = arith.truncf %24 : vector<128x128xf32> to vector<128x128xbf16>
    %c0_12 = arith.constant 0 : index
    %c0_13 = arith.constant 0 : index
    %26 = vector.load %arg6[%c0_12, %c0_13] : memref<2x128xbf16, #tpu.memory_space<vmem>>, vector<2x128xbf16>
    %cst_14 = arith.constant dense<0.000000e+00> : vector<2x128xf32>
    %27 = tpu.matmul %26, %25, %cst_14 {dimension_numbers = #tpu.dot_dimension_numbers<[1], [0], [0], [1], [0, 0, 1, 1], [], []>} : vector<2x128xbf16>, vector<128x128xbf16>, vector<2x128xf32> -> vector<2x128xf32>
    %c0_15 = arith.constant 0 : index
    %c0_16 = arith.constant 0 : index
    %28 = vector.load %arg7[%c0_15, %c0_16] : memref<2x1xf32, #tpu.memory_space<vmem>>, vector<2x1xf32>
    %29 = vector.broadcast %28 : vector<2x1xf32> to vector<2x128xf32>
    %30 = arith.addf %27, %29 : vector<2x128xf32>
    %31 = math.tanh %30 : vector<2x128xf32>
    %c0_17 = arith.constant 0 : index
    %c0_18 = arith.constant 0 : index
    %32 = vector.load %arg8[%c0_17, %c0_18] : memref<2x128xf32, #tpu.memory_space<vmem>>, vector<2x128xf32>
    tpu.vector_store %arg8[%c0_17, %c0_18], %31 {strides = array<i32>} : memref<2x128xf32, #tpu.memory_space<vmem>>, vector<2x128xf32>,
    return
  }
  func.func @transform_0(%arg0: i32) -> (i32, i32) {
    %c0_i32 = arith.constant 0 : i32
    %c0_i32_0 = arith.constant 0 : i32
    return %c0_i32, %arg0 : i32, i32
  }
  func.func @transform_1(%arg0: i32) -> (i32, i32) {
    %c0_i32 = arith.constant 0 : i32
    %c0_i32_0 = arith.constant 0 : i32
    %c0_i32_1 = arith.constant 0 : i32
    return %c0_i32, %c0_i32_0 : i32, i32
  }
  func.func @transform_2(%arg0: i32) -> (i32, i32) {
    %c0_i32 = arith.constant 0 : i32
    %c0_i32_0 = arith.constant 0 : i32
    %c0_i32_1 = arith.constant 0 : i32
    return %c0_i32, %c0_i32_0 : i32, i32
  }
  func.func @transform_3(%arg0: i32) -> (i32, i32) {
    %c0_i32 = arith.constant 0 : i32
    %c0_i32_0 = arith.constant 0 : i32
    %c0_i32_1 = arith.constant 0 : i32
    return %c0_i32, %c0_i32_0 : i32, i32
  }
  func.func @transform_4(%arg0: i32) -> (i32, i32) {
    %c0_i32 = arith.constant 0 : i32
    %c0_i32_0 = arith.constant 0 : i32
    %c0_i32_1 = arith.constant 0 : i32
    return %c0_i32, %c0_i32_0 : i32, i32
  }
  func.func @transform_5(%arg0: i32) -> (i32, i32) {
    %c0_i32 = arith.constant 0 : i32
    %c0_i32_0 = arith.constant 0 : i32
    %c0_i32_1 = arith.constant 0 : i32
    return %c0_i32, %c0_i32_0 : i32, i32
  }
  func.func @transform_6(%arg0: i32) -> (i32, i32) {
    %c0_i32 = arith.constant 0 : i32
    %c0_i32_0 = arith.constant 0 : i32
    %c0_i32_1 = arith.constant 0 : i32
    return %c0_i32, %c0_i32_0 : i32, i32
  }
  func.func @transform_7(%arg0: i32) -> (i32, i32) {
    %c0_i32 = arith.constant 0 : i32
    %c0_i32_0 = arith.constant 0 : i32
    return %c0_i32, %arg0 : i32, i32
  }
}

</mosaic_0001>

<bundles_post_ra>
// kernel: rep1_forward.1
= control target key start
LH: loop header
LB: loop body
LE: loop exit
PB: predicated region body
PF: predicated region fallthrough
CT: control target
= control target key end

     0   :  { %v831_v0 = vmov 1   ;;  %v832_v7 = vmov 0   ;;  %v140_v56 = vlaneseq  ;;  %vm834_vm0 = vmmov 0   ;;  %s1144_s1 = inlined_call_operand.vmem [shape: f32[128,2], index: 1, kind: input, shape index: {}]   ;;  %s1145_s2 = inlined_call_operand.vmem [shape: f32[128,1], index: 2, kind: input, shape index: {}]   ;;  %s1146_s4 = inlined_call_operand.vmem [shape: f32[128,1], index: 4, kind: input, shape index: {}]   ;;  %s1147_s6 = inlined_call_operand.vmem [shape: f32[2,1], index: 6, kind: input, shape index: {}]   ;;  %s1148_s3 = inlined_call_operand.vmem [shape: bf16[128,128], index: 3, kind: input, shape index: {}]   ;;  %s1149_s0 = inlined_call_operand.vmem [shape: f32[2,128], index: 0, kind: input, shape index: {}]   ;;  %s1150_s5 = inlined_call_operand.vmem [shape: bf16[2,128], index: 5, kind: input, shape index: {}]   ;;  %s1151_s7 = inlined_call_operand.vmem [shape: f32[2,128], index: 7, kind: output, shape index: {}]  }
   0x1   :  { %805 = vset.pattern.permute.xlu0 %v831_v0  ;;  %803 = vset.pattern.permute.xlu1 %v831_v0  ;;  %v29_v1 = vld [vmem:[%s1144_s1 + $0x10] sm:$0xff]  ;;  %v27_v2 = vld [vmem:[%s1144_s1] sm:$0xff]  ;;  %v28_v4 = vld [vmem:[%s1144_s1 + $0x8] sm:$0xff] }
   0x2   :  { %169 = vperm.xlu0 %805, %v29_v1   ;;  %161 = vperm.xlu1 %803, %v27_v2   ;;  %v31_v3 = vld [vmem:[%s1144_s1 + $0x20] sm:$0xff]  ;;  %v33_v5 = vld [vmem:[%s1144_s1 + $0x30] sm:$0xff]  ;;  %v30_v6 = vld [vmem:[%s1144_s1 + $0x18] sm:$0xff]  ;;  %v141_v60 = vshrl.u32 %v140_v56, 7 }
   0x3   :  { %v35_v8 = vld [vmem:[%s1144_s1 + $0x40] sm:$0xff]  ;;  %v37_v9 = vld [vmem:[%s1144_s1 + $0x50] sm:$0xff]  ;;  %v32_v13 = vld [vmem:[%s1144_s1 + $0x28] sm:$0xff] }
   0x4   :  { %v43_v10 = vld [vmem:[%s1145_s2] sm:$0xff]  ;;  %v916_v12 = vld [vmem:[%s1144_s1 + $0x70] sm:$0xff]  ;;  %v44_v15 = vld [vmem:[%s1145_s2 + $0x8] sm:$0xff] }
   0x5   :  { %v909_v11 = vld [vmem:[%s1144_s1 + $0x60] sm:$0xff]  ;;  %v45_v14 = vld [vmem:[%s1145_s2 + $0x10] sm:$0xff]  ;;  %v46_v16 = vld [vmem:[%s1145_s2 + $0x18] sm:$0xff] }
   0x6   :  { %177 = vperm.xlu0 %805, %v31_v3   ;;  %165 = vperm.xlu1 %803, %v28_v4   ;;  %v34_v17 = vld [vmem:[%s1144_s1 + $0x38] sm:$0xff]  ;;  %v48_v18 = vld [vmem:[%s1145_s2 + $0x28] sm:$0xff]  ;;  %v47_v20 = vld [vmem:[%s1145_s2 + $0x20] sm:$0xff] }
   0x7   :  { %v50_v19 = vld [vmem:[%s1145_s2 + $0x38] sm:$0xff]  ;;  %v52_v21 = vld [vmem:[%s1145_s2 + $0x48] sm:$0xff]  ;;  %v396_v25 = vld [vmem:[%s1146_s4] sm:$0xff] }
   0x8   :  { %v54_v22 = vld [vmem:[%s1145_s2 + $0x58] sm:$0xff]  ;;  %v36_v23 = vld [vmem:[%s1144_s1 + $0x48] sm:$0xff]  ;;  %v398_v26 = vld [vmem:[%s1146_s4 + $0x10] sm:$0xff] }
   0x9   :  { %v56_v24 = vld [vmem:[%s1145_s2 + $0x68] sm:$0xff]  ;;  %v49_v27 = vld [vmem:[%s1145_s2 + $0x30] sm:$0xff]  ;;  %v400_v28 = vld [vmem:[%s1146_s4 + $0x20] sm:$0xff] }
   0xa   :  { %185 = vperm.xlu0 %805, %v33_v5   ;;  %804 = vset.pattern.permute.xlu1 %v832_v7  ;;  %v402_v29 = vld [vmem:[%s1146_s4 + $0x30] sm:$0xff]  ;;  %v38_v30 = vld [vmem:[%s1144_s1 + $0x58] sm:$0xff]  ;;  %v404_v31 = vld [vmem:[%s1146_s4 + $0x40] sm:$0xff] }
   0xb   :  { %77 = vperm.xlu1 %804, %v30_v6   ;;  %v406_v32 = vld [vmem:[%s1146_s4 + $0x50] sm:$0xff]  ;;  %v51_v33 = vld [vmem:[%s1145_s2 + $0x40] sm:$0xff]  ;;  %v40_v36 = vld [vmem:[%s1144_s1 + $0x68] sm:$0xff] }
   0xc   :  { %v408_v34 = vld [vmem:[%s1146_s4 + $0x60] sm:$0xff]  ;;  %v410_v35 = vld [vmem:[%s1146_s4 + $0x70] sm:$0xff]  ;;  %v42_v39 = vld [vmem:[%s1144_s1 + $0x78] sm:$0xff] }
   0xd   :  { %v662_v37 = vld [vmem:[%s1147_s6] sm:$0x3]  ;;  %v53_v38 = vld [vmem:[%s1145_s2 + $0x50] sm:$0xff]  ;;  %v58_v46 = vld [vmem:[%s1145_s2 + $0x78] sm:$0xff] }
   0xe   :  { %193 = vperm.xlu0 %805, %v35_v8   ;;  %v55_v40 = vld [vmem:[%s1145_s2 + $0x60] sm:$0xff]  ;;  %v57_v43 = vld [vmem:[%s1145_s2 + $0x70] sm:$0xff]  ;;  %v397_v49 = vld [vmem:[%s1146_s4 + $0x8] sm:$0xff] }
   0xf   :  { %806 = vset.pattern.permute.xlu1 %v831_v0  ;;  %v399_v51 = vld [vmem:[%s1146_s4 + $0x18] sm:$0xff]  ;;  %v821_v53 = vld [vmem:[%s1148_s3] sm:$0xff]   ;;  %v401_v55 = vld [vmem:[%s1146_s4 + $0x28] sm:$0xff] }
  0x10   :  { %173 = vperm.xlu1 %806, %v30_v6   ;;  %763 = vmatprep.mubr.bf16.mxu0 %v821_v53  ;;  %v403_v59 = vld [vmem:[%s1146_s4 + $0x38] sm:$0xff]  ;;  %v405_v63 = vld [vmem:[%s1146_s4 + $0x48] sm:$0xff] }
  0x12   :  { %201 = vperm.xlu0 %805, %v37_v9  }
  0x14   :  { %807 = vset.pattern.permute.xlu1 %v832_v7 }
  0x15   :  { %262 = vperm.xlu1 %807, %v43_v10  }
  0x16   :  { %209 = vperm.xlu0 %805, %v909_v11  }
  0x19   :  { %82 = vperm.xlu1 %807, %v31_v3  }
  0x1a   :  { %217 = vperm.xlu0 %805, %v916_v12  }
  0x1d   :  { %87 = vperm.xlu1 %807, %v32_v13  }
  0x1e   :  { %818 = vset.pattern.permute.xlu0 %v832_v7 }
  0x1f   :  { %62 = vperm.xlu0 %818, %v27_v2   ;;  %v59_v2 = vld [vmem:[%s1149_s0] sm:$0x3] }
  0x21   :  { %808 = vset.pattern.permute.xlu1 %v831_v0 }
  0x22   :  { %181 = vperm.xlu1 %808, %v32_v13  }
  0x23   :  { %67 = vperm.xlu0 %818, %v28_v4  }
  0x26   :  { %809 = vset.pattern.permute.xlu1 %v832_v7 }
  0x27   :  { %72 = vperm.xlu0 %818, %v29_v1   ;;  %272 = vperm.xlu1 %809, %v45_v14   ;;  %v142_v1 = vsub.s32 0, %v141_v60 }
  0x2b   :  { %267 = vperm.xlu0 %818, %v44_v15   ;;  %92 = vperm.xlu1 %809, %v33_v5   ;;  %v407_v5 = vld [vmem:[%s1146_s4 + $0x58] sm:$0xff] }
  0x2f   :  { %277 = vperm.xlu0 %818, %v46_v16   ;;  %97 = vperm.xlu1 %809, %v34_v17  }
  0x33   :  { %287 = vperm.xlu0 %818, %v48_v18   ;;  %810 = vset.pattern.permute.xlu1 %v831_v0  ;;  %v411_v18 = vld [vmem:[%s1146_s4 + $0x78] sm:$0xff] }
  0x34   :  { %189 = vperm.xlu1 %810, %v34_v17  }
  0x37   :  { %297 = vperm.xlu0 %818, %v50_v19  }
  0x38   :  { %811 = vset.pattern.permute.xlu1 %v832_v7 }
  0x39   :  { %282 = vperm.xlu1 %811, %v47_v20  }
  0x3b   :  { %307 = vperm.xlu0 %818, %v52_v21  }
  0x3d   :  { %102 = vperm.xlu1 %811, %v35_v8  }
  0x3f   :  { %317 = vperm.xlu0 %818, %v54_v22  }
  0x41   :  { %107 = vperm.xlu1 %811, %v36_v23  }
  0x43   :  { %327 = vperm.xlu0 %818, %v56_v24  }
  0x45   :  { %812 = vset.pattern.permute.xlu1 %v831_v0 }
  0x46   :  { %197 = vperm.xlu1 %812, %v36_v23  }
  0x47   :  { %414 = vperm.xlu0 %818, %v396_v25  }
  0x4a   :  { %813 = vset.pattern.permute.xlu1 %v832_v7 }
  0x4b   :  { %424 = vperm.xlu0 %818, %v398_v26   ;;  %292 = vperm.xlu1 %813, %v49_v27  }
  0x4f   :  { %434 = vperm.xlu0 %818, %v400_v28   ;;  %112 = vperm.xlu1 %813, %v37_v9  }
  0x53   :  { %444 = vperm.xlu0 %818, %v402_v29   ;;  %117 = vperm.xlu1 %813, %v38_v30  }
  0x57   :  { %454 = vperm.xlu0 %818, %v404_v31   ;;  %814 = vset.pattern.permute.xlu1 %v831_v0 }
  0x58   :  { %205 = vperm.xlu1 %814, %v38_v30  }
  0x5b   :  { %464 = vperm.xlu0 %818, %v406_v32  }
  0x5c   :  { %815 = vset.pattern.permute.xlu1 %v832_v7 }
  0x5d   :  { %302 = vperm.xlu1 %815, %v51_v33  }
  0x5f   :  { %474 = vperm.xlu0 %818, %v408_v34  }
  0x61   :  { %122 = vperm.xlu1 %815, %v909_v11   ;;  %v409_v11 = vld [vmem:[%s1146_s4 + $0x68] sm:$0xff] }
  0x63   :  { %484 = vperm.xlu0 %818, %v410_v35  }
  0x65   :  { %127 = vperm.xlu1 %815, %v40_v36  }
  0x67   :  { %665 = vperm.xlu0 %818, %v662_v37  }
  0x69   :  { %816 = vset.pattern.permute.xlu1 %v831_v0 }
  0x6a   :  { %213 = vperm.xlu1 %816, %v40_v36  }
  0x6e   :  { %817 = vset.pattern.permute.xlu1 %v832_v7 }
  0x6f   :  { %312 = vperm.xlu1 %817, %v53_v38  }
  0x73   :  { %132 = vperm.xlu1 %817, %v916_v12  }
  0x77   :  { %137 = vperm.xlu1 %817, %v42_v39  }
  0x7b   :  { %819 = vset.pattern.permute.xlu1 %v831_v0  ;;  %v226_v0 = vsub.s32 1, %v141_v60 }
  0x7c   :  { %221 = vperm.xlu1 %819, %v42_v39  }
  0x7d   :  { %v1060_v6 = vrot.slane %v59_v2, %v226_v0 }
  0x80   :  { %820 = vset.pattern.permute.xlu1 %v832_v7  ;;  %v1062_v7 = vrot.slane %v59_v2, %v142_v1 }
  0x81   :  { %322 = vperm.xlu1 %820, %v55_v40   ;;  %v162_v41 = vpop.permute.xlu1 %161  ;;  %v170_v42 = vpop.permute.xlu0 %169 }
  0x82   :  { %v228_v12 = vmul.f32 %v1060_v6, %v162_v41  ;;  %v230_v13 = vmul.f32 %v1060_v6, %v170_v42 }
  0x85   :  { %332 = vperm.xlu1 %820, %v57_v43   ;;  %v166_v44 = vpop.permute.xlu1 %165  ;;  %v1021_v45 = vpop.permute.xlu0 %177 }
  0x86   :  { %v229_v19 = vmul.f32 %v1060_v6, %v166_v44  ;;  %v232_v40 = vmul.f32 %v1060_v6, %v1021_v45 }
  0x89   :  { %337 = vperm.xlu1 %820, %v58_v46   ;;  %v1026_v47 = vpop.permute.xlu0 %185 }
  0x8a   :  { %v78_v48 = vpop.permute.xlu1 %77 }
  0x8b   :  { %v147_v27 = vmul.f32 %v1062_v7, %v78_v48 }
  0x8d   :  { %419 = vperm.xlu1 %820, %v397_v49   ;;  %v1031_v50 = vpop.permute.xlu0 %193 }
  0x8f   :  { %v174_v52 = vpop.permute.xlu1 %173 }
  0x90   :  { %v231_v21 = vmul.f32 %v1060_v6, %v174_v52 }
  0x91   :  { %429 = vperm.xlu1 %820, %v399_v51   ;;  %v1039_v54 = vpop.permute.xlu0 %201 }
  0x92   :  { %v247_v31 = vadd.f32 %v231_v21, %v147_v27 }
  0x94   :  { %v263_v57 = vpop.permute.xlu1 %262 }
  0x95   :  { %439 = vperm.xlu1 %820, %v401_v55   ;;  %v1044_v58 = vpop.permute.xlu0 %209 }
  0x98   :  { %v83_v61 = vpop.permute.xlu1 %82 }
  0x99   :  { %449 = vperm.xlu1 %820, %v403_v59   ;;  %v1049_v62 = vpop.permute.xlu0 %217  ;;  %v148_v41 = vmul.f32 %v1062_v7, %v83_v61 }
  0x9b   :  { %v248_v51 = vadd.f32 %v232_v40, %v148_v41 }
  0x9c   :  { %v88_v3 = vpop.permute.xlu1 %87 }
  0x9d   :  { %459 = vperm.xlu1 %820, %v405_v63   ;;  %v149_v42 = vmul.f32 %v1062_v7, %v88_v3  ;;  %v234_v63 = vmul.f32 %v1060_v6, %v1026_v47 }
  0x9e   :  { %v63_v4 = vpop.permute.xlu0 %62 }
  0x9f   :  { %v144_v8 = vmul.f32 %v1062_v7, %v63_v4 }
  0xa1   :  { %469 = vperm.xlu1 %820, %v407_v5   ;;  %v182_v9 = vpop.permute.xlu1 %181  ;;  %v244_v14 = vadd.f32 %v228_v12, %v144_v8 }
  0xa2   :  { %v68_v10 = vpop.permute.xlu0 %67  ;;  %v233_v37 = vmul.f32 %v1060_v6, %v182_v9 }
  0xa3   :  { %v145_v15 = vmul.f32 %v1062_v7, %v68_v10  ;;  %v340_v24 = vadd.f32 %v263_v57, %v244_v14 }
  0xa4   :  { %v249_v48 = vadd.f32 %v233_v37, %v149_v42 }
  0xa5   :  { %479 = vperm.xlu1 %820, %v409_v11   ;;  %v245_v23 = vadd.f32 %v229_v19, %v145_v15  ;;  %v356_v32 = vmax.f32 %v340_v24, 0.0 }
  0xa6   :  { %v73_v16 = vpop.permute.xlu0 %72  ;;  %v273_v17 = vpop.permute.xlu1 %272 }
  0xa7   :  { %v146_v20 = vmul.f32 %v1062_v7, %v73_v16  ;;  %v236_v16 = vmul.f32 %v1060_v6, %v1031_v50 }
  0xa9   :  { %v246_v22 = vadd.f32 %v230_v13, %v146_v20  ;;  %489 = vperm.xlu1 %820, %v411_v18  }
  0xaa   :  { %v268_v25 = vpop.permute.xlu0 %267  ;;  %v93_v26 = vpop.permute.xlu1 %92 }
  0xab   :  { %v341_v28 = vadd.f32 %v268_v25, %v245_v23  ;;  %v342_v29 = vadd.f32 %v273_v17, %v246_v22  ;;  %v150_v0 = vmul.f32 %v1062_v7, %v93_v26 }
  0xad   :  { %v357_v30 = vmax.f32 %v341_v28, 0.0  ;;  %v358_v38 = vmax.f32 %v342_v29, 0.0  ;;  %v250_v5 = vadd.f32 %v234_v63, %v150_v0 }
  0xae   :  { %v278_v33 = vpop.permute.xlu0 %277  ;;  %v98_v34 = vpop.permute.xlu1 %97 }
  0xaf   :  { %v343_v35 = vadd.f32 %v278_v33, %v247_v31  ;;  %v372_v36 = vpack.c.bf16 %v357_v30, %v356_v32  ;;  %v151_v61 = vmul.f32 %v1062_v7, %v98_v34  ;;  %v238_v34 = vmul.f32 %v1060_v6, %v1039_v54 }
  0xb1   :  { %v359_v39 = vmax.f32 %v343_v35, 0.0  ;;  %747 = vmatprep.subr.bf16.mxu0 %v372_v36 }
  0xb2   :  { %748 = vmatpush3.bf16.msra.mxu0 %v372_v36  ;;  %v288_v46 = vpop.permute.xlu0 %287 }
  0xb3   :  { %v373_v43 = vpack.c.bf16 %v359_v39, %v358_v38  ;;  %v190_v44 = vpop.permute.xlu1 %189  ;;  %v345_v49 = vadd.f32 %v288_v46, %v249_v48 }
  0xb4   :  { %v235_v60 = vmul.f32 %v1060_v6, %v190_v44 }
  0xb5   :  { %749 = vmatprep.subr.bf16.mxu0 %v373_v43  ;;  %v361_v55 = vmax.f32 %v345_v49, 0.0 }
  0xb6   :  { %750 = vmatpush3.bf16.msra.mxu0 %v373_v43  ;;  %v251_v1 = vadd.f32 %v235_v60, %v151_v61  ;;  %v298_v3 = vpop.permute.xlu0 %297  ;;  %v242_v60 = vmul.f32 %v1060_v6, %v1049_v62  ;;  %v822_v62 = vld [vmem:[%s1148_s3 + $0x8] sm:$0xff]  }
  0xb8   :  { %v283_v52 = vpop.permute.xlu1 %282  ;;  %v347_v4 = vadd.f32 %v298_v3, %v251_v1 }
  0xb9   :  { %v344_v53 = vadd.f32 %v283_v52, %v248_v51  ;;  %v240_v52 = vmul.f32 %v1060_v6, %v1044_v58 }
  0xba   :  { %v363_v10 = vmax.f32 %v347_v4, 0.0  ;;  %v308_v20 = vpop.permute.xlu0 %307 }
  0xbb   :  { %v360_v56 = vmax.f32 %v344_v53, 0.0 }
  0xbc   :  { %v103_v57 = vpop.permute.xlu1 %102 }
  0xbd   :  { %v374_v59 = vpack.c.bf16 %v361_v55, %v360_v56  ;;  %v152_v17 = vmul.f32 %v1062_v7, %v103_v57 }
  0xbe   :  { %v318_v35 = vpop.permute.xlu0 %317 }
  0xbf   :  { %751 = vmatprep.subr.bf16.mxu0 %v374_v59  ;;  %v252_v22 = vadd.f32 %v236_v16, %v152_v17  ;;  %v833_v16 = vmov 0.0  }
  0xc0   :  { %v108_v45 = vpop.permute.xlu1 %107  ;;  %752 = vmatpush3.bf16.msra.mxu0 %v374_v59  ;;  %779 = vmatprep.subr.bf16.mxu1 %v833_v16 }
  0xc1   :  { %v153_v47 = vmul.f32 %v1062_v7, %v108_v45  ;;  %795 = vmatprep.mubr.msk.bf16.mxu1 %vm834_vm0, %v833_v16 }
  0xc2   :  { %v328_v53 = vpop.permute.xlu0 %327 }
  0xc5   :  { %v198_v2 = vpop.permute.xlu1 %197 }
  0xc6   :  { %v237_v15 = vmul.f32 %v1060_v6, %v198_v2  ;;  %v415_v17 = vpop.permute.xlu0 %414 }
  0xc8   :  { %v253_v18 = vadd.f32 %v237_v15, %v153_v47  ;;  %v827_v15 = vld [vmem:[%s1148_s3 + $0x30] sm:$0xff]   ;;  %v828_v47 = vld [vmem:[%s1148_s3 + $0x38] sm:$0xff]  }
  0xca   :  { %v293_v8 = vpop.permute.xlu1 %292  ;;  %v349_v21 = vadd.f32 %v308_v20, %v253_v18 }
  0xcb   :  { %v346_v9 = vadd.f32 %v293_v8, %v250_v5 }
  0xcc   :  { %v365_v26 = vmax.f32 %v349_v21, 0.0 }
  0xcd   :  { %v362_v11 = vmax.f32 %v346_v9, 0.0 }
  0xce   :  { %v113_v12 = vpop.permute.xlu1 %112 }
  0xcf   :  { %v375_v13 = vpack.c.bf16 %v363_v10, %v362_v11  ;;  %v154_v31 = vmul.f32 %v1062_v7, %v113_v12 }
  0xd1   :  { %753 = vmatprep.subr.bf16.mxu0 %v375_v13  ;;  %v254_v37 = vadd.f32 %v238_v34, %v154_v31 }
  0xd2   :  { %v118_v14 = vpop.permute.xlu1 %117  ;;  %754 = vmatpush3.bf16.msra.mxu0 %v375_v13  ;;  %v825_v13 = vld [vmem:[%s1148_s3 + $0x20] sm:$0xff]  }
  0xd3   :  { %v155_v50 = vmul.f32 %v1062_v7, %v118_v14  ;;  %v826_v14 = vld [vmem:[%s1148_s3 + $0x28] sm:$0xff]  }
  0xd7   :  { %v206_v19 = vpop.permute.xlu1 %205 }
  0xd8   :  { %v239_v30 = vmul.f32 %v1060_v6, %v206_v19  ;;  %v425_v19 = vpop.permute.xlu0 %424 }
  0xda   :  { %v255_v32 = vadd.f32 %v239_v30, %v155_v50 }
  0xdc   :  { %v303_v23 = vpop.permute.xlu1 %302  ;;  %v351_v36 = vadd.f32 %v318_v35, %v255_v32  ;;  %v435_v21 = vpop.permute.xlu0 %434 }
  0xdd   :  { %v348_v24 = vadd.f32 %v303_v23, %v252_v22 }
  0xde   :  { %v367_v41 = vmax.f32 %v351_v36, 0.0 }
  0xdf   :  { %v364_v25 = vmax.f32 %v348_v24, 0.0 }
  0xe0   :  { %v123_v27 = vpop.permute.xlu1 %122  ;;  %v445_v23 = vpop.permute.xlu0 %444 }
  0xe1   :  { %v376_v28 = vpack.c.bf16 %v365_v26, %v364_v25  ;;  %v156_v49 = vmul.f32 %v1062_v7, %v123_v27 }
  0xe3   :  { %755 = vmatprep.subr.bf16.mxu0 %v376_v28  ;;  %v256_v56 = vadd.f32 %v240_v52, %v156_v49 }
  0xe4   :  { %v128_v29 = vpop.permute.xlu1 %127  ;;  %756 = vmatpush3.bf16.msra.mxu0 %v376_v28  ;;  %v455_v34 = vpop.permute.xlu0 %454 }
  0xe5   :  { %v157_v48 = vmul.f32 %v1062_v7, %v128_v29 }
  0xe8   :  { %v465_v49 = vpop.permute.xlu0 %464 }
  0xe9   :  { %v214_v33 = vpop.permute.xlu1 %213 }
  0xea   :  { %v241_v46 = vmul.f32 %v1060_v6, %v214_v33 }
  0xec   :  { %v257_v51 = vadd.f32 %v241_v46, %v157_v48 }
  0xee   :  { %v313_v38 = vpop.permute.xlu1 %312  ;;  %v353_v55 = vadd.f32 %v328_v53, %v257_v51 }
  0xef   :  { %v350_v39 = vadd.f32 %v313_v38, %v254_v37 }
  0xf0   :  { %v369_v0 = vmax.f32 %v353_v55, 0.0 }
  0xf1   :  { %v366_v40 = vmax.f32 %v350_v39, 0.0 }
  0xf2   :  { %v133_v42 = vpop.permute.xlu1 %132 }
  0xf3   :  { %v377_v43 = vpack.c.bf16 %v367_v41, %v366_v40  ;;  %v158_v59 = vmul.f32 %v1062_v7, %v133_v42 }
  0xf5   :  { %757 = vmatprep.subr.bf16.mxu0 %v377_v43  ;;  %v258_v4 = vadd.f32 %v242_v60, %v158_v59 }
  0xf6   :  { %v138_v44 = vpop.permute.xlu1 %137  ;;  %758 = vmatpush3.bf16.msra.mxu0 %v377_v43 }
  0xf7   :  { %v159_v2 = vmul.f32 %v1062_v7, %v138_v44  ;;  %v824_v7 = vld [vmem:[%s1148_s3 + $0x18] sm:$0xff]  }
  0xfb   :  { %v222_v54 = vpop.permute.xlu1 %221 }
  0xfc   :  { %v243_v61 = vmul.f32 %v1060_v6, %v222_v54  ;;  %v823_v6 = vld [vmem:[%s1148_s3 + $0x10] sm:$0xff]  }
  0xfe   :  { %v259_v5 = vadd.f32 %v243_v61, %v159_v2 }
 0x100   :  { %v323_v57 = vpop.permute.xlu1 %322 }
 0x101   :  { %v352_v45 = vadd.f32 %v323_v57, %v256_v56 }
 0x103   :  { %v368_v63 = vmax.f32 %v352_v45, 0.0 }
 0x104   :  { %v333_v1 = vpop.permute.xlu1 %332 }
 0x105   :  { %v378_v3 = vpack.c.bf16 %v369_v0, %v368_v63  ;;  %v354_v58 = vadd.f32 %v333_v1, %v258_v4  ;;  %v475_v63 = vpop.permute.xlu0 %474 }
 0x107   :  { %759 = vmatprep.subr.bf16.mxu0 %v378_v3  ;;  %v370_v10 = vmax.f32 %v354_v58, 0.0 }
 0x108   :  { %v338_v8 = vpop.permute.xlu1 %337  ;;  %760 = vmatpush3.bf16.msra.mxu0 %v378_v3 }
 0x109   :  { %v355_v9 = vadd.f32 %v338_v8, %v259_v5 }
 0x10b   :  { %v371_v11 = vmax.f32 %v355_v9, 0.0 }
 0x10c   :  { %v420_v18 = vpop.permute.xlu1 %419 }
 0x10d   :  { %v379_v12 = vpack.c.bf16 %v371_v11, %v370_v10 }
 0x10f   :  { %761 = vmatprep.subr.bf16.mxu0 %v379_v12 }
 0x110   :  { %762 = vmatpush3.bf16.msra.mxu0 %v379_v12  ;;  %v430_v20 = vpop.permute.xlu1 %429  ;;  %v485_v12 = vpop.permute.xlu0 %484 }
 0x113   :  { %764 = vmatmul.mubr.bf16.vlgmr.msra.gmra.mrb[0].mxu0 %v822_v62 }
 0x114   :  { %767 = vmatprep.mubr.bf16.mxu0 %v823_v6  ;;  %v440_v22 = vpop.permute.xlu1 %439 }
 0x118   :  { %v450_v27 = vpop.permute.xlu1 %449 }
 0x11b   :  { %768 = vmatmul.mubr.bf16.gmra.mrb[4].mxu0 %v824_v7 }
 0x11c   :  { %771 = vmatprep.mubr.bf16.mxu0 %v825_v13  ;;  %v460_v38 = vpop.permute.xlu1 %459 }
 0x120   :  { %v470_v53 = vpop.permute.xlu1 %469 }
 0x123   :  { %772 = vmatmul.mubr.bf16.gmra.mrb[8].mxu0 %v826_v14 }
 0x124   :  { %775 = vmatprep.mubr.bf16.mxu0 %v827_v15  ;;  %v480_v4 = vpop.permute.xlu1 %479 }
 0x128   :  { %v490_v14 = vpop.permute.xlu1 %489 }
 0x12b   :  { %776 = vmatmul.mubr.bf16.gmra.mrb[12].mxu0 %v828_v47 }
 0x1e6   :  { %v765_v24 = vpop.f32.mrb[0].mxu0 }
 0x1e7   :  { %v583_v25 = vadd.f32 %v765_v24, %v425_v19  ;;  %v574_v26 = vpop.f32.mrb[1].mxu0 }
 0x1e8   :  { %v575_v28 = vadd.f32 %v574_v26, %v415_v17  ;;  %v766_v29 = vpop.f32.mrb[2].mxu0  ;;  %v661_v26 = vld [vmem:[%s1150_s5] sm:$0x1] }
 0x1e9   :  { %v586_v30 = vadd.f32 %v766_v29, %v430_v20  ;;  %v577_v50 = vpop.f32.mrb[3].mxu0  ;;  %v639_v32 = vmax.f32 %v583_v25, 0.0 }
 0x1ea   :  { %v578_v31 = vadd.f32 %v577_v50, %v420_v18  ;;  %v637_v35 = vmax.f32 %v575_v28, 0.0 }
 0x1eb   :  { %v640_v33 = vmax.f32 %v586_v30, 0.0 }
 0x1ec   :  { %v638_v36 = vmax.f32 %v578_v31, 0.0 }
 0x1ed   :  { %v654_v37 = vpack.c.bf16 %v640_v33, %v639_v32 }
 0x1ee   :  { %v769_v39 = vpop.f32.mrb[4].mxu0  ;;  %v653_v40 = vpack.c.bf16 %v638_v36, %v637_v35 }
 0x1ef   :  { %v599_v41 = vadd.f32 %v769_v39, %v445_v23  ;;  %v590_v42 = vpop.f32.mrb[5].mxu0 }
 0x1f0   :  { %v591_v43 = vadd.f32 %v590_v42, %v435_v21  ;;  %v770_v44 = vpop.f32.mrb[6].mxu0  ;;  %780 = vmatpush3.bf16.msra.mxu1 %v653_v40 }
 0x1f1   :  { %v602_v46 = vadd.f32 %v770_v44, %v450_v27  ;;  %v593_v48 = vpop.f32.mrb[7].mxu0  ;;  %781 = vmatprep.subr.bf16.mxu1 %v833_v16  ;;  %v643_v54 = vmax.f32 %v599_v41, 0.0  ;;  %v666_v27 = vpop.permute.xlu0 %665 }
 0x1f2   :  { %v594_v51 = vadd.f32 %v593_v48, %v440_v22  ;;  %v641_v55 = vmax.f32 %v591_v43, 0.0 }
 0x1f3   :  { %v644_v52 = vmax.f32 %v602_v46, 0.0 }
 0x1f4   :  { %v642_v56 = vmax.f32 %v594_v51, 0.0  ;;  %782 = vmatpush3.bf16.msra.mxu1 %v654_v37 }
 0x1f5   :  { %v656_v57 = vpack.c.bf16 %v644_v52, %v643_v54  ;;  %783 = vmatprep.subr.bf16.mxu1 %v833_v16 }
 0x1f6   :  { %v655_v59 = vpack.c.bf16 %v642_v56, %v641_v55  ;;  %v773_v45 = vpop.f32.mrb[8].mxu0 }
 0x1f7   :  { %v615_v60 = vadd.f32 %v773_v45, %v465_v49  ;;  %v606_v61 = vpop.f32.mrb[9].mxu0 }
 0x1f8   :  { %v607_v0 = vadd.f32 %v606_v61, %v455_v34  ;;  %v774_v1 = vpop.f32.mrb[10].mxu0  ;;  %784 = vmatpush3.bf16.msra.mxu1 %v655_v59 }
 0x1f9   :  { %v618_v2 = vadd.f32 %v774_v1, %v470_v53  ;;  %v609_v3 = vpop.f32.mrb[11].mxu0  ;;  %785 = vmatprep.subr.bf16.mxu1 %v833_v16  ;;  %v647_v5 = vmax.f32 %v615_v60, 0.0 }
 0x1fa   :  { %v610_v58 = vadd.f32 %v609_v3, %v460_v38  ;;  %v645_v9 = vmax.f32 %v607_v0, 0.0 }
 0x1fb   :  { %v648_v8 = vmax.f32 %v618_v2, 0.0 }
 0x1fc   :  { %v646_v10 = vmax.f32 %v610_v58, 0.0  ;;  %786 = vmatpush3.bf16.msra.mxu1 %v656_v57 }
 0x1fd   :  { %v658_v11 = vpack.c.bf16 %v648_v8, %v647_v5  ;;  %787 = vmatprep.subr.bf16.mxu1 %v833_v16 }
 0x1fe   :  { %v657_v62 = vpack.c.bf16 %v646_v10, %v645_v9  ;;  %v777_v6 = vpop.f32.mrb[12].mxu0 }
 0x1ff   :  { %v631_v7 = vadd.f32 %v777_v6, %v485_v12  ;;  %v622_v13 = vpop.f32.mrb[13].mxu0 }
 0x200   :  { %v623_v15 = vadd.f32 %v622_v13, %v475_v63  ;;  %v778_v47 = vpop.f32.mrb[14].mxu0  ;;  %788 = vmatpush3.bf16.msra.mxu1 %v657_v62 }
 0x201   :  { %v634_v17 = vadd.f32 %v778_v47, %v490_v14  ;;  %v625_v18 = vpop.f32.mrb[15].mxu0  ;;  %789 = vmatprep.subr.bf16.mxu1 %v833_v16  ;;  %v651_v20 = vmax.f32 %v631_v7, 0.0 }
 0x202   :  { %v626_v19 = vadd.f32 %v625_v18, %v480_v4  ;;  %v649_v22 = vmax.f32 %v623_v15, 0.0 }
 0x203   :  { %v652_v21 = vmax.f32 %v634_v17, 0.0 }
 0x204   :  { %v650_v23 = vmax.f32 %v626_v19, 0.0  ;;  %790 = vmatpush3.bf16.msra.mxu1 %v658_v11 }
 0x205   :  { %v660_v24 = vpack.c.bf16 %v652_v21, %v651_v20  ;;  %791 = vmatprep.subr.bf16.mxu1 %v833_v16 }
 0x206   :  { %v659_v25 = vpack.c.bf16 %v650_v23, %v649_v22 }
 0x208   :  { %792 = vmatpush3.bf16.msra.mxu1 %v659_v25 }
 0x209   :  { %793 = vmatprep.subr.bf16.mxu1 %v833_v16 }
 0x20c   :  { %794 = vmatpush3.bf16.msra.mxu1 %v660_v24 }
 0x20f   :  { %796 = vmatmul.mubr.bf16.vlgmr.msra.gmra.mrb[0].mxu1 %v661_v26 }
 0x2e2   :  { %v702_v28 = vpop.f32.mrb[0].mxu1 }
 0x2e3   :  { %v703_v29 = vadd.f32 %v702_v28, %v666_v27  ;;  %v797_v30 = vpop.f32.mrb[1].mxu1 }
 0x2e4   :  { %v705_v50 = vpop.f32.mrb[2].mxu1 }
 0x2e5   :  { %829 = vtanh.f32 %v703_v29  ;;  %v798_v31 = vpop.f32.mrb[3].mxu1 }
 0x2ef   :  { %v830_v32 = vpop.eup %829 }
 0x2f0   :  { %709 = vst [vmem:[%s1151_s7] sm:$0x3] %v830_v32 }

</bundles_post_ra>
